<compile_context>
chip_gen: v7x
topology: tpu7x:2x2x1
jax: 0.10.0
libtpu: 0.0.40
codegen_flags: <defaults>
</compile_context>

<pallas_src>
import jax
import jax.numpy as jnp
from jax.experimental import pallas as pl
from jax.experimental.pallas import tpu as pltpu

_LANE = 128   # lanes per vreg (fast axis)
_SUB = 8      # f32 sublanes per vreg


def _sigmoid(z):
    # sigmoid(z) == 0.5 * (1 + tanh(z/2)) : one EUP tanh + cheap VPU ops.
    return 0.5 * (jnp.tanh(0.5 * z) + 1.0)


def mlp_kernel(w1_ref, b1_ref, w2_ref, b2_ref, x_ref, o_ref):
    # x_ref: [2, S, 128]  (feature plane, batch sublane-rows, batch lanes)
    # o_ref: [S, 128]
    # w1_ref: [4, 2], b1_ref: [4], w2_ref: [1, 4], b2_ref: [1]   (all SMEM)

    # Hoist all 13 scalar SMEM reads once per grid step (no per-vreg rebroadcast).
    w1 = [[w1_ref[j, i] for i in range(2)] for j in range(4)]
    b1 = [b1_ref[j] for j in range(4)]
    w2 = [w2_ref[0, j] for j in range(4)]
    b2 = b2_ref[0]

    x0 = x_ref[0]   # [S, 128]
    x1 = x_ref[1]   # [S, 128]

    # Unrolled 2->4->1 MLP on the VPU/EUP; no hidden-layer scratch needed.
    acc = None
    for j in range(4):
        z = w1[j][0] * x0 + w1[j][1] * x1 + b1[j]
        h = _sigmoid(z)
        term = w2[j] * h
        acc = term if acc is None else acc + term

    o_ref[...] = _sigmoid(acc + b2).astype(o_ref.dtype)


def _vmem_capacity_bytes():
    try:
        cap = getattr(pltpu.get_tpu_info(), "vmem_capacity_bytes", None)
        if cap:
            return int(cap)
    except Exception:
        pass
    return 64 * 1024 * 1024  # conservative fallback (v7x per-TC VMEM)


def _tile_rows_and_vmem(rows_total):
    """Pick the batch-tile height S (in 128-lane rows, multiple of 8) and the
    scoped VMEM limit, gated by the chip generation's VMEM capacity."""
    cap = _vmem_capacity_bytes()
    # Target double-buffered in+out footprint: <= half of VMEM, <= 48 MiB.
    budget = min(cap // 2, 48 * 1024 * 1024)
    per_row_bytes = 2 * (2 + 1) * _LANE * 4   # (in 2 planes + out) * f32 * 2 buffers
    s_cap = max(_SUB, (budget // per_row_bytes) // _SUB * _SUB)
    # Prefer >= 2 grid steps when there is enough work (v7x megacore sharding).
    if rows_total >= 2 * _SUB:
        half = (((rows_total + 1) // 2) + _SUB - 1) // _SUB * _SUB
        s_cap = min(s_cap, half)
    rows_rounded = ((rows_total + _SUB - 1) // _SUB) * _SUB
    s = min(s_cap, rows_rounded)
    return s, int(budget)


def net_forward_planar(xT, w1, b1, w2, b2):
    """Feature-major entry point. xT: [2, B] f32 -> [B, 1].

    Weights/biases are in PyTorch's native [out, in] layout.
    """
    B = xT.shape[1]
    rows = (B + _LANE - 1) // _LANE
    S, vmem_limit = _tile_rows_and_vmem(rows)
    rows_p = ((rows + S - 1) // S) * S
    Bp = rows_p * _LANE

    # Zero-pad the batch tail and fold it onto (sublane-rows, lanes).
    xP = jnp.pad(xT, ((0, 0), (0, Bp - B))).reshape(2, rows_p, _LANE)

    smem = pl.BlockSpec(memory_space=pltpu.MemorySpace.SMEM)

    outP = pl.pallas_call(
        mlp_kernel,
        out_shape=jax.ShapeDtypeStruct((rows_p, _LANE), xT.dtype),
        grid=(rows_p // S,),
        in_specs=[
            smem,  # w1
            smem,  # b1
            smem,  # w2
            smem,  # b2
            pl.BlockSpec((2, S, _LANE), lambda i: (0, i, 0)),   # planar input tile
        ],
        out_specs=pl.BlockSpec((S, _LANE), lambda i: (i, 0)),
        compiler_params=pltpu.CompilerParams(
            dimension_semantics=("parallel",),
            vmem_limit_bytes=vmem_limit,
        ),
    )(w1, b1, w2, b2, xP)

    # Padded tail outputs are garbage-by-construction; slice them off.
    return outP.reshape(Bp)[:B].reshape(B, 1)


def net_forward(x, w1, b1, w2, b2):
    """PyTorch-layout entry point. x: [B, 2] f32 -> [B, 1].

    Note: the x.T repack is an extra (tiny) XLA op; producers that can emit
    feature-major activations should call net_forward_planar directly.
    """
    return net_forward_planar(x.T, w1, b1, w2, b2)


def init_params(key):
    """Deterministic init mimicking PyTorch's default Linear init:
    U(-1/sqrt(fan_in), 1/sqrt(fan_in)); weights in PyTorch [out, in] layout."""
    k1, k2, k3, k4 = jax.random.split(key, 4)
    bound1 = 1.0 / jnp.sqrt(2.0)   # fc1 fan_in = 2
    bound2 = 1.0 / jnp.sqrt(4.0)   # fc2 fan_in = 4
    w1 = jax.random.uniform(k1, (4, 2), jnp.float32, -bound1, bound1)
    b1 = jax.random.uniform(k2, (4,), jnp.float32, -bound1, bound1)
    w2 = jax.random.uniform(k3, (1, 4), jnp.float32, -bound2, bound2)
    b2 = jax.random.uniform(k4, (1,), jnp.float32, -bound2, bound2)
    return w1, b1, w2, b2


if __name__ == "__main__":
    key = jax.random.PRNGKey(0)
    k_params, k_x = jax.random.split(key)

    w1, b1, w2, b2 = init_params(k_params)
    x = jax.random.normal(k_x, (8, 2), jnp.float32)   # batch=8, in_features=2

    out = net_forward(x, w1, b1, w2, b2)
    jax.block_until_ready(out)

    # Reference check in plain JAX (same math as the PyTorch forward),
    # computed at full f32 precision.
    hp = jax.lax.Precision.HIGHEST
    h_ref = jax.nn.sigmoid(jnp.matmul(x, w1.T, precision=hp) + b1)
    y_ref = jax.nn.sigmoid(jnp.matmul(h_ref, w2.T, precision=hp) + b2)

    assert out.shape == (8, 1)
    assert jnp.allclose(out, y_ref, atol=1e-5, rtol=1e-5), (
        f"max abs err = {jnp.max(jnp.abs(out - y_ref))}")

    print("KERNEL_OK")
</pallas_src>

<mosaic_0001>
module attributes {stable_mosaic.version = 11 : i64} {
  func.func @mlp_kernel(%arg0: i32, %arg1: memref<4x2xf32, #tpu.memory_space<smem>>, %arg2: memref<4xf32, #tpu.memory_space<smem>>, %arg3: memref<1x4xf32, #tpu.memory_space<smem>>, %arg4: memref<1xf32, #tpu.memory_space<smem>>, %arg5: memref<2x8x128xf32, #tpu.memory_space<vmem>>, %arg6: memref<8x128xf32, #tpu.memory_space<vmem>>) attributes {dimension_semantics = [#tpu.dimension_semantics<parallel>], iteration_bounds = array<i64: 1>, scalar_prefetch = 0 : i64, scratch_operands = 0 : i64, tpu.core_type = #tpu.core_type<tc>, window_params = [{transform_indices = @transform_0, window_bounds = array<i64: 4, 2>}, {transform_indices = @transform_1, window_bounds = array<i64: 4>}, {transform_indices = @transform_2, window_bounds = array<i64: 1, 4>}, {transform_indices = @transform_3, window_bounds = array<i64: 1>}, {transform_indices = @transform_4, window_bounds = array<i64: 2, 8, 128>}, {transform_indices = @transform_5, window_bounds = array<i64: 8, 128>}]} {
    %c0 = arith.constant 0 : index
    %c0_0 = arith.constant 0 : index
    %0 = memref.load %arg1[%c0, %c0_0] : memref<4x2xf32, #tpu.memory_space<smem>>
    %c0_1 = arith.constant 0 : index
    %c1 = arith.constant 1 : index
    %1 = memref.load %arg1[%c0_1, %c1] : memref<4x2xf32, #tpu.memory_space<smem>>
    %c1_2 = arith.constant 1 : index
    %c0_3 = arith.constant 0 : index
    %2 = memref.load %arg1[%c1_2, %c0_3] : memref<4x2xf32, #tpu.memory_space<smem>>
    %c1_4 = arith.constant 1 : index
    %c1_5 = arith.constant 1 : index
    %3 = memref.load %arg1[%c1_4, %c1_5] : memref<4x2xf32, #tpu.memory_space<smem>>
    %c2 = arith.constant 2 : index
    %c0_6 = arith.constant 0 : index
    %4 = memref.load %arg1[%c2, %c0_6] : memref<4x2xf32, #tpu.memory_space<smem>>
    %c2_7 = arith.constant 2 : index
    %c1_8 = arith.constant 1 : index
    %5 = memref.load %arg1[%c2_7, %c1_8] : memref<4x2xf32, #tpu.memory_space<smem>>
    %c3 = arith.constant 3 : index
    %c0_9 = arith.constant 0 : index
    %6 = memref.load %arg1[%c3, %c0_9] : memref<4x2xf32, #tpu.memory_space<smem>>
    %c3_10 = arith.constant 3 : index
    %c1_11 = arith.constant 1 : index
    %7 = memref.load %arg1[%c3_10, %c1_11] : memref<4x2xf32, #tpu.memory_space<smem>>
    %c0_12 = arith.constant 0 : index
    %8 = memref.load %arg2[%c0_12] : memref<4xf32, #tpu.memory_space<smem>>
    %c1_13 = arith.constant 1 : index
    %9 = memref.load %arg2[%c1_13] : memref<4xf32, #tpu.memory_space<smem>>
    %c2_14 = arith.constant 2 : index
    %10 = memref.load %arg2[%c2_14] : memref<4xf32, #tpu.memory_space<smem>>
    %c3_15 = arith.constant 3 : index
    %11 = memref.load %arg2[%c3_15] : memref<4xf32, #tpu.memory_space<smem>>
    %c0_16 = arith.constant 0 : index
    %c0_17 = arith.constant 0 : index
    %12 = memref.load %arg3[%c0_16, %c0_17] : memref<1x4xf32, #tpu.memory_space<smem>>
    %c0_18 = arith.constant 0 : index
    %c1_19 = arith.constant 1 : index
    %13 = memref.load %arg3[%c0_18, %c1_19] : memref<1x4xf32, #tpu.memory_space<smem>>
    %c0_20 = arith.constant 0 : index
    %c2_21 = arith.constant 2 : index
    %14 = memref.load %arg3[%c0_20, %c2_21] : memref<1x4xf32, #tpu.memory_space<smem>>
    %c0_22 = arith.constant 0 : index
    %c3_23 = arith.constant 3 : index
    %15 = memref.load %arg3[%c0_22, %c3_23] : memref<1x4xf32, #tpu.memory_space<smem>>
    %c0_24 = arith.constant 0 : index
    %16 = memref.load %arg4[%c0_24] : memref<1xf32, #tpu.memory_space<smem>>
    %c0_25 = arith.constant 0 : index
    %c0_26 = arith.constant 0 : index
    %c0_27 = arith.constant 0 : index
    %17 = vector.load %arg5[%c0_25, %c0_26, %c0_27] : memref<2x8x128xf32, #tpu.memory_space<vmem>>, vector<1x8x128xf32>
    %18 = vector.shape_cast %17 : vector<1x8x128xf32> to vector<8x128xf32>
    %c1_28 = arith.constant 1 : index
    %c0_29 = arith.constant 0 : index
    %c0_30 = arith.constant 0 : index
    %19 = vector.load %arg5[%c1_28, %c0_29, %c0_30] : memref<2x8x128xf32, #tpu.memory_space<vmem>>, vector<1x8x128xf32>
    %20 = vector.shape_cast %19 : vector<1x8x128xf32> to vector<8x128xf32>
    %21 = vector.broadcast %0 : f32 to vector<8x128xf32>
    %22 = arith.mulf %21, %18 : vector<8x128xf32>
    %23 = vector.broadcast %1 : f32 to vector<8x128xf32>
    %24 = arith.mulf %23, %20 : vector<8x128xf32>
    %25 = arith.addf %22, %24 : vector<8x128xf32>
    %26 = vector.broadcast %8 : f32 to vector<8x128xf32>
    %27 = arith.addf %25, %26 : vector<8x128xf32>
    %cst = arith.constant 5.000000e-01 : f32
    %28 = vector.broadcast %cst : f32 to vector<8x128xf32>
    %29 = arith.mulf %28, %27 : vector<8x128xf32>
    %30 = math.tanh %29 : vector<8x128xf32>
    %cst_31 = arith.constant 1.000000e+00 : f32
    %31 = vector.broadcast %cst_31 : f32 to vector<8x128xf32>
    %32 = arith.addf %30, %31 : vector<8x128xf32>
    %cst_32 = arith.constant 5.000000e-01 : f32
    %33 = vector.broadcast %cst_32 : f32 to vector<8x128xf32>
    %34 = arith.mulf %33, %32 : vector<8x128xf32>
    %35 = vector.broadcast %12 : f32 to vector<8x128xf32>
    %36 = arith.mulf %35, %34 : vector<8x128xf32>
    %37 = vector.broadcast %2 : f32 to vector<8x128xf32>
    %38 = arith.mulf %37, %18 : vector<8x128xf32>
    %39 = vector.broadcast %3 : f32 to vector<8x128xf32>
    %40 = arith.mulf %39, %20 : vector<8x128xf32>
    %41 = arith.addf %38, %40 : vector<8x128xf32>
    %42 = vector.broadcast %9 : f32 to vector<8x128xf32>
    %43 = arith.addf %41, %42 : vector<8x128xf32>
    %cst_33 = arith.constant 5.000000e-01 : f32
    %44 = vector.broadcast %cst_33 : f32 to vector<8x128xf32>
    %45 = arith.mulf %44, %43 : vector<8x128xf32>
    %46 = math.tanh %45 : vector<8x128xf32>
    %cst_34 = arith.constant 1.000000e+00 : f32
    %47 = vector.broadcast %cst_34 : f32 to vector<8x128xf32>
    %48 = arith.addf %46, %47 : vector<8x128xf32>
    %cst_35 = arith.constant 5.000000e-01 : f32
    %49 = vector.broadcast %cst_35 : f32 to vector<8x128xf32>
    %50 = arith.mulf %49, %48 : vector<8x128xf32>
    %51 = vector.broadcast %13 : f32 to vector<8x128xf32>
    %52 = arith.mulf %51, %50 : vector<8x128xf32>
    %53 = arith.addf %36, %52 : vector<8x128xf32>
    %54 = vector.broadcast %4 : f32 to vector<8x128xf32>
    %55 = arith.mulf %54, %18 : vector<8x128xf32>
    %56 = vector.broadcast %5 : f32 to vector<8x128xf32>
    %57 = arith.mulf %56, %20 : vector<8x128xf32>
    %58 = arith.addf %55, %57 : vector<8x128xf32>
    %59 = vector.broadcast %10 : f32 to vector<8x128xf32>
    %60 = arith.addf %58, %59 : vector<8x128xf32>
    %cst_36 = arith.constant 5.000000e-01 : f32
    %61 = vector.broadcast %cst_36 : f32 to vector<8x128xf32>
    %62 = arith.mulf %61, %60 : vector<8x128xf32>
    %63 = math.tanh %62 : vector<8x128xf32>
    %cst_37 = arith.constant 1.000000e+00 : f32
    %64 = vector.broadcast %cst_37 : f32 to vector<8x128xf32>
    %65 = arith.addf %63, %64 : vector<8x128xf32>
    %cst_38 = arith.constant 5.000000e-01 : f32
    %66 = vector.broadcast %cst_38 : f32 to vector<8x128xf32>
    %67 = arith.mulf %66, %65 : vector<8x128xf32>
    %68 = vector.broadcast %14 : f32 to vector<8x128xf32>
    %69 = arith.mulf %68, %67 : vector<8x128xf32>
    %70 = arith.addf %53, %69 : vector<8x128xf32>
    %71 = vector.broadcast %6 : f32 to vector<8x128xf32>
    %72 = arith.mulf %71, %18 : vector<8x128xf32>
    %73 = vector.broadcast %7 : f32 to vector<8x128xf32>
    %74 = arith.mulf %73, %20 : vector<8x128xf32>
    %75 = arith.addf %72, %74 : vector<8x128xf32>
    %76 = vector.broadcast %11 : f32 to vector<8x128xf32>
    %77 = arith.addf %75, %76 : vector<8x128xf32>
    %cst_39 = arith.constant 5.000000e-01 : f32
    %78 = vector.broadcast %cst_39 : f32 to vector<8x128xf32>
    %79 = arith.mulf %78, %77 : vector<8x128xf32>
    %80 = math.tanh %79 : vector<8x128xf32>
    %cst_40 = arith.constant 1.000000e+00 : f32
    %81 = vector.broadcast %cst_40 : f32 to vector<8x128xf32>
    %82 = arith.addf %80, %81 : vector<8x128xf32>
    %cst_41 = arith.constant 5.000000e-01 : f32
    %83 = vector.broadcast %cst_41 : f32 to vector<8x128xf32>
    %84 = arith.mulf %83, %82 : vector<8x128xf32>
    %85 = vector.broadcast %15 : f32 to vector<8x128xf32>
    %86 = arith.mulf %85, %84 : vector<8x128xf32>
    %87 = arith.addf %70, %86 : vector<8x128xf32>
    %88 = vector.broadcast %16 : f32 to vector<8x128xf32>
    %89 = arith.addf %87, %88 : vector<8x128xf32>
    %cst_42 = arith.constant 5.000000e-01 : f32
    %90 = vector.broadcast %cst_42 : f32 to vector<8x128xf32>
    %91 = arith.mulf %90, %89 : vector<8x128xf32>
    %92 = math.tanh %91 : vector<8x128xf32>
    %cst_43 = arith.constant 1.000000e+00 : f32
    %93 = vector.broadcast %cst_43 : f32 to vector<8x128xf32>
    %94 = arith.addf %92, %93 : vector<8x128xf32>
    %cst_44 = arith.constant 5.000000e-01 : f32
    %95 = vector.broadcast %cst_44 : f32 to vector<8x128xf32>
    %96 = arith.mulf %95, %94 : vector<8x128xf32>
    %c0_45 = arith.constant 0 : index
    %c0_46 = arith.constant 0 : index
    %97 = vector.load %arg6[%c0_45, %c0_46] : memref<8x128xf32, #tpu.memory_space<vmem>>, vector<8x128xf32>
    tpu.vector_store %arg6[%c0_45, %c0_46], %96 {strides = array<i32>} : memref<8x128xf32, #tpu.memory_space<vmem>>, vector<8x128xf32>,
    return
  }
  func.func @transform_0(%arg0: i32) -> (i32, i32) {
    %c0_i32 = arith.constant 0 : i32
    %c0_i32_0 = arith.constant 0 : i32
    %c0_i32_1 = arith.constant 0 : i32
    return %c0_i32, %c0_i32_0 : i32, i32
  }
  func.func @transform_1(%arg0: i32) -> i32 {
    %c0_i32 = arith.constant 0 : i32
    %c0_i32_0 = arith.constant 0 : i32
    return %c0_i32 : i32
  }
  func.func @transform_2(%arg0: i32) -> (i32, i32) {
    %c0_i32 = arith.constant 0 : i32
    %c0_i32_0 = arith.constant 0 : i32
    %c0_i32_1 = arith.constant 0 : i32
    return %c0_i32, %c0_i32_0 : i32, i32
  }
  func.func @transform_3(%arg0: i32) -> i32 {
    %c0_i32 = arith.constant 0 : i32
    %c0_i32_0 = arith.constant 0 : i32
    return %c0_i32 : i32
  }
  func.func @transform_4(%arg0: i32) -> (i32, i32, i32) {
    %c0_i32 = arith.constant 0 : i32
    %c0_i32_0 = arith.constant 0 : i32
    %c0_i32_1 = arith.constant 0 : i32
    return %c0_i32, %arg0, %c0_i32_0 : i32, i32, i32
  }
  func.func @transform_5(%arg0: i32) -> (i32, i32) {
    %c0_i32 = arith.constant 0 : i32
    %c0_i32_0 = arith.constant 0 : i32
    return %arg0, %c0_i32 : i32, i32
  }
}

</mosaic_0001>

<bundles_post_ra>
// kernel: tpu_custom_call.1
= control target key start
LH: loop header
LB: loop body
LE: loop exit
PB: predicated region body
PF: predicated region fallthrough
CT: control target
= control target key end

     0   :  { %11 = vsyncpa [#allocation5], 0  ;;  %s315_s0 = inlined_call_operand.vmem [shape: f32[4,2], index: 0, kind: input, shape index: {}]   ;;  %s316_s1 = inlined_call_operand.vmem [shape: f32[4], index: 1, kind: input, shape index: {}]   ;;  %s317_s2 = inlined_call_operand.vmem [shape: f32[1,4], index: 2, kind: input, shape index: {}]   ;;  %s318_s3 = inlined_call_operand.<no memory space> [shape: f32[1], index: 3, kind: input, shape index: {}]   ;;  %s319_s4 = inlined_call_operand.vmem [shape: f32[2,8,128], index: 4, kind: input, shape index: {}]   ;;  %s320_s5 = inlined_call_operand.hbm [shape: f32[8,128], index: 5, kind: output, shape index: {}]  }
   0x1   :  { %12 = vsyncpa [#allocation7], 0  ;;  %s30_s20 = sshll.u32 %s316_s1, 4  ;;  %s31_s20 = int_to_ptr.vmem [resolvable:$true] %s30_s20 }
   0x2   :  { %13 = vsyncpa [#allocation4], 0  ;;  %s20_s23 = sshll.u32 %s315_s0, 4  ;;  %s184_s24 = scalar_lea.vmem %s31_s20, 16  ;;  %s21_s23 = int_to_ptr.vmem [resolvable:$true] %s20_s23 }
   0x3   :  { %p185_p0 = scmp.ne.s32.totalorder %s31_s20, %s184_s24  ;;  %p189_p1 = scmp.lt.s32.totalorder %s31_s20, %s31_s20 }
   0x4   :  { %p190_p2 = scmp.lt.s32.totalorder %s184_s24, %s184_s24 }
   0x6   :  { %p191_p3 = por %p190_p2, %p189_p1 }
   0x8   :  { %p192_p4 = pnand %p191_p3, %p185_p0 }
   0xa   :  { %195 = shalt.err (!%p192_p4)
}
   0xb   :  { %s248_s25 = smov [#allocation6]   ;;  %s196_s26 = scalar_lea.vmem %s21_s23, 64 }
   0xc   :  { %33 = dma.vmem_to_smem %s31_s20, 16, %s248_s25, [#allocation7]  }
   0xd   :  { %p197_p5 = scmp.ne.s32.totalorder %s21_s23, %s196_s26  ;;  %p201_p6 = scmp.lt.s32.totalorder %s21_s23, %s21_s23 }
   0xe   :  { %p202_p7 = scmp.lt.s32.totalorder %s196_s26, %s196_s26 }
  0x10   :  { %p203_p8 = por %p202_p7, %p201_p6 }
  0x12   :  { %p204_p9 = pnand %p203_p8, %p197_p5 }
  0x14   :  { %207 = shalt.err (!%p204_p9)
}
  0x15   :  { %s249_s1 = smov [#allocation3]   ;;  %s40_s28 = sshll.u32 %s317_s2, 4  ;;  %s41_s28 = int_to_ptr.vmem [resolvable:$true] %s40_s28 }
  0x16   :  { %23 = dma.vmem_to_smem %s21_s23, 64, %s249_s1, [#allocation5]  }
  0x17   :  { %s208_s29 = scalar_lea.vmem %s41_s28, 16  ;;  %p213_p11 = scmp.lt.s32.totalorder %s41_s28, %s41_s28 }
  0x18   :  { %p209_p10 = scmp.ne.s32.totalorder %s41_s28, %s208_s29  ;;  %p214_p12 = scmp.lt.s32.totalorder %s208_s29, %s208_s29 }
  0x1a   :  { %p215_p13 = por %p214_p12, %p213_p11 }
  0x1c   :  { %p216_p0 = pnand %p215_p13, %p209_p10 }
  0x1e   :  { %219 = shalt.err (!%p216_p0)
}
  0x1f   :  { %s250_s30 = smov [#allocation8]  }
  0x20   :  { %43 = dma.vmem_to_smem %s41_s28, 16, %s250_s30, [#allocation7]  }
  0x21   :  { %242 = dma.done.wait [#allocation5], 64  }
  0x22   :  { %243 = vsyncadd [#allocation5], 4294967232 }
  0x23   :  { %244 = dma.done.wait [#allocation7], 32  }
  0x24   :  { %245 = vsyncadd [#allocation7], 4294967264 }
  0x25   :  { %57 = sfence }
  0x26   :  { %s58_s6 = sld [smem:[#allocation3]]  ;;  %s156_s7 = sld [smem:[#allocation3 + $0x1]]  ;;  %v75_v0 = vld [vmem:[%s319_s4] sm:$0xff]  ;;  %v169_v1 = vld [vmem:[%s319_s4 + $0x8] sm:$0xff]  ;;  %v133_v56 = vstv %s318_s3 }
  0x27   :  { %s157_s8 = sld [smem:[#allocation3 + $0x80]]  ;;  %s158_s9 = sld [smem:[#allocation3 + $0x81]] }
  0x28   :  { %s159_s2 = sld [smem:[#allocation3 + $0x100]]  ;;  %s160_s10 = sld [smem:[#allocation3 + $0x101]] }
  0x29   :  { %s161_s11 = sld [smem:[#allocation3 + $0x180]]  ;;  %s162_s12 = sld [smem:[#allocation3 + $0x181]] }
  0x2a   :  { %s66_s13 = sld [smem:[#allocation6]]  ;;  %s163_s14 = sld [smem:[#allocation6 + $0x1]] }
  0x2b   :  { %s164_s19 = sld [smem:[#allocation6 + $0x2]]  ;;  %s297_s20 = sld [smem:[#allocation6 + $0x3]] }
  0x2c   :  { %v78_v2 = vstv %s58_s6  ;;  %v80_v3 = vstv %s156_s7  ;;  %s70_s4 = sld [smem:[#allocation8]]  ;;  %s166_s21 = sld [smem:[#allocation8 + $0x1]] }
  0x2d   :  { %v79_v4 = vmul.f32 %v78_v2, %v75_v0  ;;  %v81_v5 = vmul.f32 %v169_v1, %v80_v3  ;;  %v91_v6 = vstv %s157_s8  ;;  %v93_v7 = vstv %s158_s9  ;;  %s167_s22 = sld [smem:[#allocation8 + $0x2]]  ;;  %s168_s23 = sld [smem:[#allocation8 + $0x3]] }
  0x2e   :  { %v92_v8 = vmul.f32 %v91_v6, %v75_v0  ;;  %v94_v9 = vmul.f32 %v169_v1, %v93_v7  ;;  %v105_v10 = vstv %s159_s2  ;;  %v107_v11 = vstv %s160_s10  ;;  %s251_s26 = smov [#allocation9]  }
  0x2f   :  { %v82_v12 = vadd.f32 %v81_v5, %v79_v4  ;;  %v106_v13 = vmul.f32 %v105_v10, %v75_v0  ;;  %v108_v14 = vmul.f32 %v169_v1, %v107_v11  ;;  %v119_v15 = vstv %s161_s11  ;;  %s146_s1 = sshll.u32 %s251_s26, 4  ;;  %s147_s1 = int_to_ptr.vmem [resolvable:$true] %s146_s1 }
  0x30   :  { %v83_v16 = vstv %s66_s13  ;;  %v95_v17 = vadd.f32 %v94_v9, %v92_v8  ;;  %v96_v18 = vstv %s163_s14  ;;  %v120_v19 = vmul.f32 %v119_v15, %v75_v0  ;;  %s220_s0 = scalar_lea.vmem %s147_s1, 128  ;;  %p225_p2 = scmp.lt.s32.totalorder %s147_s1, %s147_s1 }
  0x31   :  { %v84_v20 = vadd.f32 %v83_v16, %v82_v12  ;;  %v109_v21 = vadd.f32 %v108_v14, %v106_v13  ;;  %v110_v22 = vstv %s164_s19  ;;  %v121_v23 = vstv %s162_s12  ;;  %p221_p1 = scmp.ne.s32.totalorder %s147_s1, %s220_s0  ;;  %p226_p3 = scmp.lt.s32.totalorder %s220_s0, %s220_s0 }
  0x32   :  { %v97_v24 = vadd.f32 %v96_v18, %v95_v17  ;;  %v122_v25 = vmul.f32 %v169_v1, %v121_v23  ;;  %v124_v28 = vstv %s297_s20  ;;  %v89_v38 = vstv %s70_s4 }
  0x33   :  { %v85_v26 = vmul.f32 0.5, %v84_v20  ;;  %v111_v27 = vadd.f32 %v110_v22, %v109_v21  ;;  %v102_v41 = vstv %s166_s21  ;;  %v116_v44 = vstv %s167_s22  ;;  %p227_p4 = por %p226_p3, %p225_p2 }
  0x34   :  { %v98_v29 = vmul.f32 0.5, %v97_v24  ;;  %v123_v30 = vadd.f32 %v122_v25, %v120_v19  ;;  %v130_v51 = vstv %s168_s23 }
  0x35   :  { %174 = vtanh.f32 %v85_v26  ;;  %v112_v31 = vmul.f32 0.5, %v111_v27  ;;  %p228_p5 = pnand %p227_p4, %p221_p1 }
  0x36   :  { %176 = vtanh.f32 %v98_v29  ;;  %v125_v32 = vadd.f32 %v124_v28, %v123_v30 }
  0x37   :  { %178 = vtanh.f32 %v112_v31 }
  0x38   :  { %v126_v33 = vmul.f32 0.5, %v125_v32 }
  0x3a   :  { %180 = vtanh.f32 %v126_v33 }
  0x3f   :  { %v175_v34 = vpop.eup %174 }
  0x40   :  { %v177_v35 = vpop.eup %176  ;;  %v87_v36 = vadd.f32 1.0, %v175_v34 }
  0x41   :  { %v179_v37 = vpop.eup %178  ;;  %v100_v39 = vadd.f32 1.0, %v177_v35 }
  0x42   :  { %v88_v40 = vmul.f32 0.5, %v87_v36  ;;  %v114_v42 = vadd.f32 1.0, %v179_v37 }
  0x43   :  { %v101_v43 = vmul.f32 0.5, %v100_v39 }
  0x44   :  { %v181_v45 = vpop.eup %180  ;;  %v90_v46 = vmul.f32 %v89_v38, %v88_v40  ;;  %v115_v47 = vmul.f32 0.5, %v114_v42 }
  0x45   :  { %v103_v48 = vmul.f32 %v102_v41, %v101_v43  ;;  %v128_v49 = vadd.f32 1.0, %v181_v45 }
  0x46   :  { %v117_v50 = vmul.f32 %v116_v44, %v115_v47 }
  0x47   :  { %v104_v52 = vadd.f32 %v103_v48, %v90_v46  ;;  %v129_v53 = vmul.f32 0.5, %v128_v49 }
  0x49   :  { %v118_v54 = vadd.f32 %v117_v50, %v104_v52  ;;  %v131_v55 = vmul.f32 %v130_v51, %v129_v53 }
  0x4b   :  { %v132_v57 = vadd.f32 %v131_v55, %v118_v54 }
  0x4d   :  { %v134_v58 = vadd.f32 %v133_v56, %v132_v57 }
  0x4f   :  { %v135_v59 = vmul.f32 0.5, %v134_v58 }
  0x51   :  { %182 = vtanh.f32 %v135_v59 }
  0x5b   :  { %v183_v60 = vpop.eup %182 }
  0x5c   :  { %v137_v61 = vadd.f32 1.0, %v183_v60 }
  0x5e   :  { %v138_v62 = vmul.f32 0.5, %v137_v61 }
  0x60   :  { %139 = vst [vmem:[#allocation9] sm:$0xff] %v138_v62 }
  0x61   :  { %231 = shalt.err (!%p228_p5)
}
  0x62   :  { %s232_s28 = scalar_lea.hbm %s320_s5, 128 }
  0x63   :  { %p233_p6 = scmp.ne.s32.totalorder %s320_s5, %s232_s28  ;;  %p236_p7 = scmp.lt.u32.totalorder %s232_s28, %s320_s5 }
  0x65   :  { %p238_p8 = pnand %p236_p7, %p233_p6 }
  0x67   :  { %241 = shalt.err (!%p238_p8)
}
  0x68   :  { %149 = dma.vmem_to_hbm [thread:$0]  %s147_s1, 128, %s320_s5, [#allocation4]  }
  0x69   :  { %246 = dma.done.wait [#allocation4], 128  }
  0x6a   :  { %247 = vsyncadd [#allocation4], 4294967168 }
  0x6b   :  { %153 = vsyncpa [#allocation4], 1 }
  0x6c   :  { %154 = vsyncpa [#allocation5], 1 }
  0x6d   :  { %155 = vsyncpa [#allocation7], 1 }

</bundles_post_ra>
